<compile_context>
chip_gen: v6e
topology: v6e:2x2x1
jax: 0.10.0
libtpu: 0.0.40
codegen_flags: <defaults>
</compile_context>

<pallas_src>
import functools
import math

import jax
import jax.numpy as jnp
from jax.experimental import pallas as pl
from jax.experimental.pallas import tpu as pltpu


# ----------------------------------------------------------------------------
# Wrapper-side layout glue (plain JAX; fused by XLA under jit)
# ----------------------------------------------------------------------------
def _avg_pool2d_2x2(x):
    n, c, h, w = x.shape
    return x.reshape(n, c, h // 2, 2, w // 2, 2).mean(axis=(3, 5))


def _interp_matrix(out_size, in_size):
    """Bilinear interpolation matrix (out_size, in_size); matches
    F.interpolate(mode='bilinear', align_corners=False)."""
    if out_size == in_size:
        return jnp.eye(out_size, dtype=jnp.float32)
    scale = in_size / out_size
    src = (jnp.arange(out_size, dtype=jnp.float32) + 0.5) * scale - 0.5
    src = jnp.maximum(src, 0.0)
    i0 = jnp.minimum(jnp.floor(src).astype(jnp.int32), in_size - 1)
    i1 = jnp.minimum(i0 + 1, in_size - 1)
    w1 = src - i0.astype(jnp.float32)
    w0 = 1.0 - w1
    rows = jnp.arange(out_size)
    m = jnp.zeros((out_size, in_size), jnp.float32)
    m = m.at[rows, i0].add(w0)
    m = m.at[rows, i1].add(w1)
    return m


def _bilinear_resize_nchw(x, out_h, out_w):
    n, c, h, w = x.shape
    if (out_h, out_w) == (h, w):
        return x
    rh = _interp_matrix(out_h, h)
    rw = _interp_matrix(out_w, w)
    return jnp.einsum('oh,nchw,pw->ncop', rh, x, rw)


def _im2col_nchw(x, kh, kw, padding):
    """(N, C, H, W) -> (N, C*kh*kw, Hout*Wout); column order matches
    weights.reshape(Cout, C*kh*kw)."""
    n, c, h, w = x.shape
    xp = jnp.pad(x, ((0, 0), (0, 0), (padding, padding), (padding, padding)))
    hout = h + 2 * padding - kh + 1
    wout = w + 2 * padding - kw + 1
    taps = []
    for i in range(kh):
        for j in range(kw):
            taps.append(xp[:, :, i:i + hout, j:j + wout])
    p = jnp.stack(taps, axis=2)                  # (N, C, kh*kw, Hout, Wout)
    return p.reshape(n, c * kh * kw, hout * wout), hout, wout


# ----------------------------------------------------------------------------
# Fused gOctaveConv forward (USE_BALANCE=False, groups=1, dilation=1)
# ----------------------------------------------------------------------------
def goctave_conv_forward(xset, weights, *, in_channels, out_channels,
                         alpha_in=(0.5, 0.5), alpha_out=(0.5, 0.5),
                         stride=1, padding=1, dilation=1, groups=1, bias=None,
                         compute_dtype=None, spatial_split=None):
    """Returns a list (len == len(alpha_out)) of (N, Cout_j, Hj, Wj) arrays
    (None for empty output branches)."""
    # TODO(synk): groups > 1 and dilation > 1 not implemented.
    assert groups == 1 and dilation == 1

    if not isinstance(xset, (list, tuple)):
        xset = [xset]
    xset = list(xset)

    a_in = [0.0]
    tmpsum = 0.0
    for a in alpha_in:
        tmpsum += a
        a_in.append(tmpsum)
    a_out = [0.0]
    tmpsum = 0.0
    for a in alpha_out:
        tmpsum += a
        a_out.append(tmpsum)
    inbranch, outbranch = len(alpha_in), len(alpha_out)

    kh, kw = int(weights.shape[2]), int(weights.shape[3])
    w2d = weights.reshape(weights.shape[0], -1)      # (Cout, Cin*kh*kw)

    # stride-2 average pooling (applied to every live input branch, as in torch)
    xs, batch, x_dtype = [], None, None
    for i in range(inbranch):
        x = xset[i] if i < len(xset) else None
        if x is not None:
            if stride == 2:
                x = _avg_pool2d_2x2(x)
            batch = int(x.shape[0])
            x_dtype = x.dtype
        xs.append(x)

    out_dtype = jnp.result_type(x_dtype, weights.dtype)
    cdt = jnp.dtype(compute_dtype) if compute_dtype is not None else jnp.dtype(out_dtype)

    records, cache = [], {}

    def add_input(key, arr, kind, hw=None):
        if key in cache:
            return cache[key]
        idx = len(records)
        cache[key] = idx
        records.append({'arr': arr, 'kind': kind, 'hw': hw})
        return idx

    branch_meta = [None] * outbranch
    scratch_shapes = []

    for j in range(outbranch):
        begin_y = int(round(out_channels * a_out[j]))
        end_y = int(round(out_channels * a_out[j + 1]))
        if begin_y == end_y:
            continue
        cout_j = end_y - begin_y
        assert j < len(xset) and xset[j] is not None, (
            "gOctaveConv needs xset[%d] to define that output branch's shape" % j)
        tgt = (int(xset[j].shape[2]), int(xset[j].shape[3]))

        dir_p, dir_w = [], []
        up_groups = {}               # (hout, wout) -> {'w': [...], 'i': [...]}
        n_contrib = 0
        dir_hw = None

        for i in range(inbranch):
            x = xs[i]
            if x is None:
                continue
            begin_x = int(round(in_channels * a_in[i] / groups))
            end_x = int(round(in_channels * a_in[i + 1] / groups))
            if begin_x == end_x:
                continue
            w_ij = w2d[begin_y:end_y, begin_x * kh * kw:end_x * kh * kw].astype(cdt)
            scale = 2 ** (i - j)

            conv_in = _bilinear_resize_nchw(x, *tgt) if scale < 1 else x
            hin, win = int(conv_in.shape[2]), int(conv_in.shape[3])
            hout = hin + 2 * padding - kh + 1
            wout = win + 2 * padding - kw + 1

            if scale <= 1 or (hout, wout) == tgt:
                # conv output already at the branch resolution: K-concat group
                patches, ph, pw = _im2col_nchw(conv_in, kh, kw, padding)
                if dir_hw is None:
                    dir_hw = (ph, pw)
                else:
                    assert dir_hw == (ph, pw), (
                        "branch %d direct terms disagree on spatial shape" % j)
                dir_p.append(patches.astype(cdt))
                dir_w.append(w_ij)
            else:
                grp = up_groups.setdefault((hout, wout), {'w': [], 'i': []})
                grp['w'].append(w_ij)
                grp['i'].append(i)
            n_contrib += 1

        if not dir_p and not up_groups:
            continue

        out_hw = dir_hw if dir_hw is not None else tgt
        if dir_hw is not None and up_groups:
            assert dir_hw == tgt, (
                "branch %d mixes conv-shape %s with interpolate target %s"
                % (j, dir_hw, tgt))
        HWj = out_hw[0] * out_hw[1]

        meta = {'cout': cout_j, 'hw2d': out_hw, 'hw': HWj,
                'n_contrib': n_contrib, 'dir_w': None, 'dir_p': None,
                'ups': [], 'bias': None}

        if dir_p:
            pcat = dir_p[0] if len(dir_p) == 1 else jnp.concatenate(dir_p, axis=1)
            wcat = dir_w[0] if len(dir_w) == 1 else jnp.concatenate(dir_w, axis=1)
            meta['dir_p'] = add_input(('pdir', j), pcat, 'pdir', hw=HWj)
            meta['dir_w'] = add_input(('wdir', j), wcat, 'w')

        for (hout, wout), grp in up_groups.items():
            # low-res patches (deduped across output branches)
            pkey = ('pup', tuple(grp['i']), hout, wout)
            if pkey not in cache:
                plist = []
                for i in grp['i']:
                    p_i, ph, pw = _im2col_nchw(xs[i], kh, kw, padding)
                    assert (ph, pw) == (hout, wout)
                    plist.append(p_i.astype(cdt))
                pcat = plist[0] if len(plist) == 1 else jnp.concatenate(plist, axis=1)
                add_input(pkey, pcat, 'pup')
            p_idx = cache[pkey]

            wcat = (grp['w'][0] if len(grp['w']) == 1
                    else jnp.concatenate(grp['w'], axis=1))
            w_idx = add_input(('wup', j, hout, wout), wcat, 'w')

            # Dense bilinear-resize matrix (hout*wout, HWj), streamed per
            # spatial tile via its BlockSpec -> never resident as a whole.
            # TODO(synk): replace with separable Rh / Rw two-dot upsample
            # (needs an in-kernel einshape/relayout of the (Cout, h*w) slab).
            ukey = ('u', hout, wout, out_hw)
            if ukey not in cache:
                rh = _interp_matrix(out_hw[0], hout)
                rw = _interp_matrix(out_hw[1], wout)
                u = jnp.kron(rh, rw).T.astype(cdt)          # (hout*wout, HWj)
                add_input(ukey, u, 'u', hw=HWj)
            u_idx = cache[ukey]

            scr_idx = len(scratch_shapes)
            scratch_shapes.append(pltpu.VMEM((cout_j, hout * wout), jnp.float32))
            meta['ups'].append({'p': p_idx, 'w': w_idx, 'u': u_idx,
                                'scr': scr_idx, 'hw_lo': hout * wout})

        if bias is not None:
            b_j = jnp.asarray(bias)[begin_y:end_y].reshape(cout_j, 1)
            meta['bias'] = add_input(('b', j), b_j.astype(jnp.float32), 'w')

        branch_meta[j] = meta

    live = [j for j in range(outbranch) if branch_meta[j] is not None]
    if not live:
        return [None] * outbranch

    # ------------------------------------------------------------------------
    # Spatial split selection: every live branch's H*W is split into S tiles;
    # S > 1 is only allowed when every branch tile is a multiple of 128 lanes
    # (lane-dense, unmasked stores).  Pick the smallest S whose double-buffered
    # block working set fits the VMEM budget ("biggest tile that fits").
    # ------------------------------------------------------------------------
    hw_list = [branch_meta[j]['hw'] for j in live]
    cands = [1]
    cand = 2
    while all(hw % cand == 0 and (hw // cand) % 128 == 0 for hw in hw_list):
        cands.append(cand)
        cand *= 2

    out_isize = jnp.dtype(out_dtype).itemsize

    def blocks_bytes(split):
        total = 0
        for r in records:
            a = r['arr']
            isz = jnp.dtype(a.dtype).itemsize
            if r['kind'] == 'pdir':
                total += int(a.shape[1]) * (r['hw'] // split) * isz
            elif r['kind'] == 'u':
                total += int(a.shape[0]) * (r['hw'] // split) * isz
            elif r['kind'] == 'pup':
                total += int(a.shape[1]) * int(a.shape[2]) * isz
            else:                                   # 'w' / bias: full slab
                total += int(a.size) * isz
        for j in live:
            bm = branch_meta[j]
            total += bm['cout'] * (bm['hw'] // split) * out_isize
        return total

    scratch_bytes = sum(branch_meta[j]['cout'] * g['hw_lo'] * 4
                        for j in live for g in branch_meta[j]['ups'])

    budget = 28 << 20            # double-buffered blocks + scratch target
    if spatial_split is not None:
        assert spatial_split in cands, (spatial_split, cands)
        S = spatial_split
    else:
        S = cands[-1]
        for c in cands:
            if 2 * blocks_bytes(c) + scratch_bytes <= budget:
                S = c
                break

    vmem_limit = int(max(32 << 20,
                         min(48 << 20,
                             2 * blocks_bytes(S) + scratch_bytes + (8 << 20))))

    # ------------------------------------------------------------------------
    # BlockSpecs.  Grid-invariant slabs ('w', bias) use constant index maps;
    # they could additionally use pipeline_mode=pl.Buffered(1) to save VMEM.
    # ------------------------------------------------------------------------
    flat_inputs, in_specs = [], []
    for r in records:
        a = r['arr']
        flat_inputs.append(a)
        if r['kind'] == 'pdir':
            tile = r['hw'] // S
            in_specs.append(pl.BlockSpec((None, int(a.shape[1]), tile),
                                         lambda b, sp: (b, 0, sp)))
        elif r['kind'] == 'u':
            tile = r['hw'] // S
            in_specs.append(pl.BlockSpec((int(a.shape[0]), tile),
                                         lambda b, sp: (0, sp)))
        elif r['kind'] == 'pup':
            in_specs.append(pl.BlockSpec((None, int(a.shape[1]), int(a.shape[2])),
                                         lambda b, sp: (b, 0, 0)))
        else:
            in_specs.append(pl.BlockSpec(tuple(int(d) for d in a.shape),
                                         lambda b, sp: (0, 0)))

    out_shapes, out_specs = [], []
    for j in live:
        bm = branch_meta[j]
        tile = bm['hw'] // S
        out_shapes.append(
            jax.ShapeDtypeStruct((batch, bm['cout'], bm['hw']), out_dtype))
        out_specs.append(pl.BlockSpec((None, bm['cout'], tile),
                                      lambda b, sp: (b, 0, sp)))

    kernel_branches = [branch_meta[j] for j in live]
    num_in = len(flat_inputs)
    num_out = len(live)
    has_ups = any(bm['ups'] for bm in kernel_branches)

    # ------------------------------------------------------------------------
    # Fused kernel.  One grid step per (batch, spatial tile).  Direct terms are
    # one long-K MXU dot; upsample terms reuse the per-batch low-res conv kept
    # in f32 VMEM scratch and apply their streamed resize-matrix tile.
    # ------------------------------------------------------------------------
    def kernel(*refs):
        in_refs = refs[:num_in]
        out_refs = refs[num_in:num_in + num_out]
        scr_refs = refs[num_in + num_out:]
        sp = pl.program_id(1)

        for o_ref, bm in zip(out_refs, kernel_branches):
            acc = None
            if bm['dir_w'] is not None:
                acc = jnp.dot(in_refs[bm['dir_w']][...], in_refs[bm['dir_p']][...],
                              preferred_element_type=jnp.float32)
            for g in bm['ups']:
                scr = scr_refs[g['scr']]

                @pl.when(sp == 0)
                def _conv_lowres(scr=scr, wi=g['w'], pi=g['p']):
                    # low-res conv: once per batch element, stays in VMEM
                    scr[...] = jnp.dot(in_refs[wi][...], in_refs[pi][...],
                                       preferred_element_type=jnp.float32)

                u_ref = in_refs[g['u']]
                contrib = jnp.dot(scr[...].astype(u_ref.dtype), u_ref[...],
                                  preferred_element_type=jnp.float32)
                acc = contrib if acc is None else acc + contrib

            if bm['bias'] is not None:
                # PyTorch adds the conv bias once per contributing input branch.
                acc = acc + (float(bm['n_contrib'])
                             * in_refs[bm['bias']][...].astype(jnp.float32))
            o_ref[...] = acc.astype(o_ref.dtype)

    dim_sem = ("parallel", "arbitrary" if has_ups else "parallel")

    results = pl.pallas_call(
        kernel,
        grid=(batch, S),
        in_specs=in_specs,
        out_specs=tuple(out_specs),
        out_shape=tuple(out_shapes),
        scratch_shapes=tuple(scratch_shapes),
        compiler_params=pltpu.CompilerParams(
            dimension_semantics=dim_sem,
            vmem_limit_bytes=vmem_limit),
    )(*flat_inputs)

    yset = [None] * outbranch
    for r, j in zip(results, live):
        bm = branch_meta[j]
        ho, wo = bm['hw2d']
        yset[j] = r.reshape(batch, bm['cout'], ho, wo)
    return yset


# ----------------------------------------------------------------------------
# Pure-JAX mirror of the PyTorch forward (for correctness checking only)
# ----------------------------------------------------------------------------
def _conv2d_ref(x, w, padding):
    return jax.lax.conv_general_dilated(
        x, w, window_strides=(1, 1), padding=[(padding, padding)] * 2,
        dimension_numbers=("NCHW", "OIHW", "NCHW"))


def _bilinear_gather_ref(x, out_h, out_w):
    n, c, h, w = x.shape
    if (out_h, out_w) == (h, w):
        return x

    def coords(o, i):
        scale = i / o
        cc = (jnp.arange(o, dtype=jnp.float32) + 0.5) * scale - 0.5
        cc = jnp.maximum(cc, 0.0)
        i0 = jnp.minimum(jnp.floor(cc).astype(jnp.int32), i - 1)
        i1 = jnp.minimum(i0 + 1, i - 1)
        w1 = cc - i0.astype(jnp.float32)
        return i0, i1, 1.0 - w1, w1

    y0, y1, wy0, wy1 = coords(out_h, h)
    x0, x1, wx0, wx1 = coords(out_w, w)
    rows = (x[:, :, y0, :] * wy0[None, None, :, None]
            + x[:, :, y1, :] * wy1[None, None, :, None])
    return rows[:, :, :, x0] * wx0 + rows[:, :, :, x1] * wx1


def goctave_conv_ref(xset, weights, *, in_channels, out_channels,
                     alpha_in=(0.5, 0.5), alpha_out=(0.5, 0.5),
                     stride=1, padding=1, groups=1, bias=None):
    a_in = [0.0]
    tmpsum = 0.0
    for a in alpha_in:
        tmpsum += a
        a_in.append(tmpsum)
    a_out = [0.0]
    tmpsum = 0.0
    for a in alpha_out:
        tmpsum += a
        a_out.append(tmpsum)
    inbranch, outbranch = len(alpha_in), len(alpha_out)
    if not isinstance(xset, (list, tuple)):
        xset = [xset]
    ysets = [[] for _ in range(outbranch)]
    for i in range(inbranch):
        if xset[i] is None:
            continue
        x = _avg_pool2d_2x2(xset[i]) if stride == 2 else xset[i]
        begin_x = int(round(in_channels * a_in[i] / groups))
        end_x = int(round(in_channels * a_in[i + 1] / groups))
        if begin_x == end_x:
            continue
        for j in range(outbranch):
            begin_y = int(round(out_channels * a_out[j]))
            end_y = int(round(out_channels * a_out[j + 1]))
            if begin_y == end_y:
                continue
            scale = 2 ** (i - j)
            shp = (int(xset[j].shape[2]), int(xset[j].shape[3]))
            w = weights[begin_y:end_y, begin_x:end_x]
            b = None if bias is None else jnp.asarray(bias)[begin_y:end_y]

            def add_b(y):
                return y if b is None else y + b[None, :, None, None]

            if scale > 1:
                y = _bilinear_gather_ref(add_b(_conv2d_ref(x, w, padding)), *shp)
            elif scale < 1:
                y = add_b(_conv2d_ref(_bilinear_gather_ref(x, *shp), w, padding))
            else:
                y = add_b(_conv2d_ref(x, w, padding))
            ysets[j].append(y)
    out = []
    for j in range(outbranch):
        if ysets[j]:
            acc = ysets[j][0]
            for y in ysets[j][1:]:
                acc = acc + y
            out.append(acc)
        else:
            out.append(None)
    return out


if __name__ == "__main__":
    key = jax.random.PRNGKey(0)
    k_w, k_x0, k_x1, k_w2, k_x2h, k_x2l, k_b2 = jax.random.split(key, 7)

    # ---- Test 1: toy octave config (untiled path, S=1, no bias) -------------
    in_channels, out_channels, KH, KW = 4, 4, 3, 3
    bound = 1.0 / math.sqrt(in_channels * KH * KW)    # kaiming_uniform_(a=sqrt(5))
    weights = jax.random.uniform(
        k_w, (out_channels, in_channels, KH, KW),
        minval=-bound, maxval=bound, dtype=jnp.float32)
    x_high = jax.random.normal(k_x0, (2, 2, 16, 16), dtype=jnp.float32)
    x_low = jax.random.normal(k_x1, (2, 2, 8, 8), dtype=jnp.float32)

    fwd = jax.jit(functools.partial(
        goctave_conv_forward, in_channels=in_channels,
        out_channels=out_channels, alpha_in=(0.5, 0.5), alpha_out=(0.5, 0.5),
        stride=1, padding=1, groups=1))
    yset = fwd([x_high, x_low], weights)
    yset = [jax.block_until_ready(y) if y is not None else None for y in yset]

    yref = goctave_conv_ref(
        [x_high, x_low], weights, in_channels=in_channels,
        out_channels=out_channels, alpha_in=(0.5, 0.5), alpha_out=(0.5, 0.5),
        stride=1, padding=1, groups=1)
    for got, want in zip(yset, yref):
        assert (got is None) == (want is None)
        if got is not None:
            assert got.shape == want.shape
            assert jnp.allclose(got, want, rtol=1e-4, atol=1e-4), (
                float(jnp.max(jnp.abs(got - want))))
    assert yset[0].shape == (2, 2, 16, 16)
    assert yset[1].shape == (2, 2, 8, 8)

    # ---- Test 2: bigger config exercising spatial tiling (S=2) + bias -------
    c2_in, c2_out = 16, 16
    bound2 = 1.0 / math.sqrt(c2_in * KH * KW)
    weights2 = jax.random.uniform(
        k_w2, (c2_out, c2_in, KH, KW),
        minval=-bound2, maxval=bound2, dtype=jnp.float32)
    bias2 = jax.random.uniform(
        k_b2, (c2_out,), minval=-bound2, maxval=bound2, dtype=jnp.float32)
    x2_high = jax.random.normal(k_x2h, (2, 8, 32, 32), dtype=jnp.float32)
    x2_low = jax.random.normal(k_x2l, (2, 8, 16, 16), dtype=jnp.float32)

    fwd2 = jax.jit(functools.partial(
        goctave_conv_forward, in_channels=c2_in, out_channels=c2_out,
        alpha_in=(0.5, 0.5), alpha_out=(0.5, 0.5), stride=1, padding=1,
        groups=1, bias=bias2, spatial_split=2))
    yset2 = fwd2([x2_high, x2_low], weights2)
    yset2 = [jax.block_until_ready(y) if y is not None else None for y in yset2]

    yref2 = goctave_conv_ref(
        [x2_high, x2_low], weights2, in_channels=c2_in, out_channels=c2_out,
        alpha_in=(0.5, 0.5), alpha_out=(0.5, 0.5), stride=1, padding=1,
        groups=1, bias=bias2)
    for got, want in zip(yset2, yref2):
        assert (got is None) == (want is None)
        if got is not None:
            assert got.shape == want.shape
            assert jnp.allclose(got, want, rtol=1e-3, atol=1e-3), (
                float(jnp.max(jnp.abs(got - want))))
    assert yset2[0].shape == (2, 8, 32, 32)
    assert yset2[1].shape == (2, 8, 16, 16)

    print("KERNEL_OK")
</pallas_src>

<mosaic_0001>
module attributes {stable_mosaic.version = 11 : i64} {
  func.func private @main(%arg0: i32) attributes {dimension_semantics = [#tpu.dimension_semantics<core_parallel>], iteration_bounds = array<i64: 2>, tpu.core_type = #tpu.core_type<sc_scalar_subcore>, window_params = []} {
    return
  }
}

module attributes {stable_mosaic.version = 11 : i64} {
  func.func private @main(%arg0: i32) attributes {dimension_semantics = [#tpu.dimension_semantics<core_parallel>], iteration_bounds = array<i64: 2>, tpu.core_type = #tpu.core_type<sc_scalar_subcore>, window_params = []} {
    return
  }
}

module attributes {stable_mosaic.version = 11 : i64} {
  func.func @kernel(%arg0: i32, %arg1: i32, %arg2: memref<1x18x256xf32, #tpu.memory_space<vmem>>, %arg3: memref<2x18xf32, #tpu.memory_space<vmem>>, %arg4: memref<1x18x64xf32, #tpu.memory_space<vmem>>, %arg5: memref<2x18xf32, #tpu.memory_space<vmem>>, %arg6: memref<64x256xf32, #tpu.memory_space<vmem>>, %arg7: memref<1x36x64xf32, #tpu.memory_space<vmem>>, %arg8: memref<2x36xf32, #tpu.memory_space<vmem>>, %arg9: memref<1x2x256xf32, #tpu.memory_space<vmem>>, %arg10: memref<1x2x64xf32, #tpu.memory_space<vmem>>, %arg11: memref<2x64xf32, #tpu.memory_space<vmem>>) attributes {dimension_semantics = [#tpu.dimension_semantics<parallel>, #tpu.dimension_semantics<arbitrary>], iteration_bounds = array<i64: 2, 1>, scalar_prefetch = 0 : i64, scratch_operands = 1 : i64, tpu.core_type = #tpu.core_type<tc>, window_params = [{transform_indices = @transform_0, window_bounds = array<i64: 1, 18, 256>}, {pipeline_mode = #tpu.pipeline_mode<synchronous>, transform_indices = @transform_1, window_bounds = array<i64: 2, 18>}, {transform_indices = @transform_2, window_bounds = array<i64: 1, 18, 64>}, {pipeline_mode = #tpu.pipeline_mode<synchronous>, transform_indices = @transform_3, window_bounds = array<i64: 2, 18>}, {transform_indices = @transform_4, window_bounds = array<i64: 64, 256>}, {transform_indices = @transform_5, window_bounds = array<i64: 1, 36, 64>}, {pipeline_mode = #tpu.pipeline_mode<synchronous>, transform_indices = @transform_6, window_bounds = array<i64: 2, 36>}, {transform_indices = @transform_7, window_bounds = array<i64: 1, 2, 256>}, {transform_indices = @transform_8, window_bounds = array<i64: 1, 2, 64>}]} {
    %c0 = arith.constant 0 : index
    %c0_0 = arith.constant 0 : index
    %0 = vector.load %arg3[%c0, %c0_0] : memref<2x18xf32, #tpu.memory_space<vmem>>, vector<2x18xf32>
    %c0_1 = arith.constant 0 : index
    %c0_2 = arith.constant 0 : index
    %c0_3 = arith.constant 0 : index
    %1 = vector.load %arg2[%c0_1, %c0_2, %c0_3] : memref<1x18x256xf32, #tpu.memory_space<vmem>>, vector<1x18x256xf32>
    %2 = vector.shape_cast %1 : vector<1x18x256xf32> to vector<18x256xf32>
    %cst = arith.constant dense<0.000000e+00> : vector<2x256xf32>
    %3 = tpu.matmul %0, %2, %cst {dimension_numbers = #tpu.dot_dimension_numbers<[1], [0], [0], [1], [0, 0, 1, 1], [], []>} : vector<2x18xf32>, vector<18x256xf32>, vector<2x256xf32> -> vector<2x256xf32>
    %c0_i32 = arith.constant 0 : i32
    %4 = arith.cmpi eq, %arg1, %c0_i32 : i32
    %5 = arith.extui %4 : i1 to i32
    %c0_i32_4 = arith.constant 0 : i32
    %6 = arith.cmpi ne, %5, %c0_i32_4 : i32
    scf.if %6 {
      %c0_22 = arith.constant 0 : index
      %c0_23 = arith.constant 0 : index
      %21 = vector.load %arg5[%c0_22, %c0_23] : memref<2x18xf32, #tpu.memory_space<vmem>>, vector<2x18xf32>
      %c0_24 = arith.constant 0 : index
      %c0_25 = arith.constant 0 : index
      %c0_26 = arith.constant 0 : index
      %22 = vector.load %arg4[%c0_24, %c0_25, %c0_26] : memref<1x18x64xf32, #tpu.memory_space<vmem>>, vector<1x18x64xf32>
      %23 = vector.shape_cast %22 : vector<1x18x64xf32> to vector<18x64xf32>
      %cst_27 = arith.constant dense<0.000000e+00> : vector<2x64xf32>
      %24 = tpu.matmul %21, %23, %cst_27 {dimension_numbers = #tpu.dot_dimension_numbers<[1], [0], [0], [1], [0, 0, 1, 1], [], []>} : vector<2x18xf32>, vector<18x64xf32>, vector<2x64xf32> -> vector<2x64xf32>
      %c0_28 = arith.constant 0 : index
      %c0_29 = arith.constant 0 : index
      %25 = vector.load %arg11[%c0_28, %c0_29] : memref<2x64xf32, #tpu.memory_space<vmem>>, vector<2x64xf32>
      tpu.vector_store %arg11[%c0_28, %c0_29], %24 {strides = array<i32>} : memref<2x64xf32, #tpu.memory_space<vmem>>, vector<2x64xf32>,
    } else {
    }
    %c0_5 = arith.constant 0 : index
    %c0_6 = arith.constant 0 : index
    %7 = vector.load %arg11[%c0_5, %c0_6] : memref<2x64xf32, #tpu.memory_space<vmem>>, vector<2x64xf32>
    %c0_7 = arith.constant 0 : index
    %c0_8 = arith.constant 0 : index
    %8 = vector.load %arg6[%c0_7, %c0_8] : memref<64x256xf32, #tpu.memory_space<vmem>>, vector<64x256xf32>
    %cst_9 = arith.constant dense<0.000000e+00> : vector<2x256xf32>
    %9 = tpu.matmul %7, %8, %cst_9 {dimension_numbers = #tpu.dot_dimension_numbers<[1], [0], [0], [1], [0, 0, 1, 1], [], []>} : vector<2x64xf32>, vector<64x256xf32>, vector<2x256xf32> -> vector<2x256xf32>
    %10 = arith.addf %3, %9 : vector<2x256xf32>
    %c0_10 = arith.constant 0 : index
    %c0_11 = arith.constant 0 : index
    %c0_12 = arith.constant 0 : index
    %11 = vector.load %arg9[%c0_10, %c0_11, %c0_12] : memref<1x2x256xf32, #tpu.memory_space<vmem>>, vector<1x2x256xf32>
    %12 = vector.shape_cast %11 : vector<1x2x256xf32> to vector<2x256xf32>
    %13 = vector.shape_cast %10 : vector<2x256xf32> to vector<1x2x256xf32>
    tpu.vector_store %arg9[%c0_10, %c0_11, %c0_12], %13 {strides = array<i32>} : memref<1x2x256xf32, #tpu.memory_space<vmem>>, vector<1x2x256xf32>,
    %c0_13 = arith.constant 0 : index
    %c0_14 = arith.constant 0 : index
    %14 = vector.load %arg8[%c0_13, %c0_14] : memref<2x36xf32, #tpu.memory_space<vmem>>, vector<2x36xf32>
    %c0_15 = arith.constant 0 : index
    %c0_16 = arith.constant 0 : index
    %c0_17 = arith.constant 0 : index
    %15 = vector.load %arg7[%c0_15, %c0_16, %c0_17] : memref<1x36x64xf32, #tpu.memory_space<vmem>>, vector<1x36x64xf32>
    %16 = vector.shape_cast %15 : vector<1x36x64xf32> to vector<36x64xf32>
    %cst_18 = arith.constant dense<0.000000e+00> : vector<2x64xf32>
    %17 = tpu.matmul %14, %16, %cst_18 {dimension_numbers = #tpu.dot_dimension_numbers<[1], [0], [0], [1], [0, 0, 1, 1], [], []>} : vector<2x36xf32>, vector<36x64xf32>, vector<2x64xf32> -> vector<2x64xf32>
    %c0_19 = arith.constant 0 : index
    %c0_20 = arith.constant 0 : index
    %c0_21 = arith.constant 0 : index
    %18 = vector.load %arg10[%c0_19, %c0_20, %c0_21] : memref<1x2x64xf32, #tpu.memory_space<vmem>>, vector<1x2x64xf32>
    %19 = vector.shape_cast %18 : vector<1x2x64xf32> to vector<2x64xf32>
    %20 = vector.shape_cast %17 : vector<2x64xf32> to vector<1x2x64xf32>
    tpu.vector_store %arg10[%c0_19, %c0_20, %c0_21], %20 {strides = array<i32>} : memref<1x2x64xf32, #tpu.memory_space<vmem>>, vector<1x2x64xf32>,
    return
  }
  func.func @transform_0(%arg0: i32, %arg1: i32) -> (i32, i32, i32) {
    %c0_i32 = arith.constant 0 : i32
    %c0_i32_0 = arith.constant 0 : i32
    return %arg0, %c0_i32, %arg1 : i32, i32, i32
  }
  func.func @transform_1(%arg0: i32, %arg1: i32) -> (i32, i32) {
    %c0_i32 = arith.constant 0 : i32
    %c0_i32_0 = arith.constant 0 : i32
    %c0_i32_1 = arith.constant 0 : i32
    return %c0_i32, %c0_i32_0 : i32, i32
  }
  func.func @transform_2(%arg0: i32, %arg1: i32) -> (i32, i32, i32) {
    %c0_i32 = arith.constant 0 : i32
    %c0_i32_0 = arith.constant 0 : i32
    %c0_i32_1 = arith.constant 0 : i32
    return %arg0, %c0_i32, %c0_i32_0 : i32, i32, i32
  }
  func.func @transform_3(%arg0: i32, %arg1: i32) -> (i32, i32) {
    %c0_i32 = arith.constant 0 : i32
    %c0_i32_0 = arith.constant 0 : i32
    %c0_i32_1 = arith.constant 0 : i32
    return %c0_i32, %c0_i32_0 : i32, i32
  }
  func.func @transform_4(%arg0: i32, %arg1: i32) -> (i32, i32) {
    %c0_i32 = arith.constant 0 : i32
    %c0_i32_0 = arith.constant 0 : i32
    return %c0_i32, %arg1 : i32, i32
  }
  func.func @transform_5(%arg0: i32, %arg1: i32) -> (i32, i32, i32) {
    %c0_i32 = arith.constant 0 : i32
    %c0_i32_0 = arith.constant 0 : i32
    return %arg0, %c0_i32, %arg1 : i32, i32, i32
  }
  func.func @transform_6(%arg0: i32, %arg1: i32) -> (i32, i32) {
    %c0_i32 = arith.constant 0 : i32
    %c0_i32_0 = arith.constant 0 : i32
    %c0_i32_1 = arith.constant 0 : i32
    return %c0_i32, %c0_i32_0 : i32, i32
  }
  func.func @transform_7(%arg0: i32, %arg1: i32) -> (i32, i32, i32) {
    %c0_i32 = arith.constant 0 : i32
    %c0_i32_0 = arith.constant 0 : i32
    return %arg0, %c0_i32, %arg1 : i32, i32, i32
  }
  func.func @transform_8(%arg0: i32, %arg1: i32) -> (i32, i32, i32) {
    %c0_i32 = arith.constant 0 : i32
    %c0_i32_0 = arith.constant 0 : i32
    return %arg0, %c0_i32, %arg1 : i32, i32, i32
  }
}

</mosaic_0001>

<bundles_post_ra>
// kernel: goctave_conv_forward.1
= control target key start
LH: loop header
LB: loop body
LE: loop exit
PB: predicated region body
PF: predicated region fallthrough
CT: control target
= control target key end

     0   :  { %s1133_s27 = smov 0   ;;  %s1135_s28 = smov 0   ;;  %s1258_s0 = inlined_call_operand.vmem [shape: f32[2,18,256], index: 0, kind: input, shape index: {}]   ;;  %s1259_s1 = inlined_call_operand.vmem [shape: f32[2,18], index: 1, kind: input, shape index: {}]   ;;  %s1260_s2 = inlined_call_operand.vmem [shape: f32[2,18,64], index: 2, kind: input, shape index: {}]   ;;  %s1261_s3 = inlined_call_operand.vmem [shape: f32[2,18], index: 3, kind: input, shape index: {}]   ;;  %s1262_s4 = inlined_call_operand.vmem [shape: f32[64,256], index: 4, kind: input, shape index: {}]   ;;  %s1263_s5 = inlined_call_operand.vmem [shape: f32[2,36,64], index: 5, kind: input, shape index: {}]   ;;  %s1264_s6 = inlined_call_operand.vmem [shape: f32[2,36], index: 6, kind: input, shape index: {}]   ;;  %s1265_s7 = inlined_call_operand.vmem [shape: f32[2,2,256], index: 7, kind: output, shape index: {0}]   ;;  %s1266_s8 = inlined_call_operand.vmem [shape: f32[2,2,64], index: 8, kind: output, shape index: {1}]  }
   0x1   :  { %s1137_s29 = smov 0  }
   0x2 LB: > { %s31_s30 = sadd.s32 1, %s1080_s28  ;;  %p982_p0 = scmp.ge.s32.totalorder %s1084_s29, 1  ;;  %s1084_s29 = sphi %s1137_s29, %s19_s29   ;;  %s1080_s28 = sphi %s1135_s28, %s1268_s28   ;;  %s1076_s27 = sphi %s1133_s27, %s1267_s27  }
   0x3   : > { %p33_p1 = scmp.ge.s32.totalorder %s31_s30, 2  ;;  %p324_p2 = scmp.lt.s32.totalorder %s1084_s29, 3 }
   0x5   : > { %s1270_s30 = smov (%p33_p1, %s31_s30), 0  ;;  %p325_p3 = pnand %p982_p0, %p324_p2 }
   0x6   : > { %p392_p4 = scmp.lt.s32.totalorder (!%p325_p3), %s1076_s27, 1 }
   0x7   : > { %328 = sbr.rel (%p325_p3) target bundleno = 423 (0x1a7), region = 48 }
   0xc   : > { %v1086_v0 = vmov 0.0   ;;  %vm1087_vm0 = vmmov 0   ;;  %v548_v1 = vld [vmem:[%s1262_s4 + $0x78] sm:$0xff]  ;;  %v547_v2 = vld [vmem:[%s1262_s4 + $0x70] sm:$0xff]  ;;  %v546_v3 = vld [vmem:[%s1262_s4 + $0x68] sm:$0xff]  ;;  %s1272_s27 = smov (!%p392_p4, %s1076_s27), 1 }
   0xd   : > { %1011 = vmatprep.subr.mxu0 %v1086_v0  ;;  %1017 = vmatprep.mubr.msk.f32.mxu0 %vm1087_vm0, %v1086_v0  ;;  %v545_v4 = vld [vmem:[%s1262_s4 + $0x60] sm:$0xff]  ;;  %v544_v5 = vld [vmem:[%s1262_s4 + $0x58] sm:$0xff]  ;;  %s1034_s19 = smul.u32 24, %s1272_s27  ;;  %v543_v6 = vld [vmem:[%s1262_s4 + $0x50] sm:$0xff]  ;;  %vm456_vm1 = vcmask 1041408   ;;  %vm452_vm2 = vcmask 146432  }
   0xe   : > { %569 = vmatprep.subr.mxu1 %v548_v1  ;;  %617 = vmatprep.mubr.f32.mxu1 %v1086_v0  ;;  %s1033_s22 = smul.u32 48, %s1272_s27  ;;  %v542_v7 = vld [vmem:[%s1262_s4 + $0x48] sm:$0xff]  ;;  %v448_v11 = vld [vmem:[%s1261_s3] sm:$0x3]  ;;  %v540_v18 = vld [vmem:[%s1262_s4 + $0x38] sm:$0xff]  ;;  %vm728_vm3 = vcmask 1043456  }
   0xf   : > { %570 = vmatpush1.msra.mxu1 %v547_v2  ;;  %s405_s9 = scalar_lea.vmem %s1260_s2, %s1034_s19  ;;  %v541_v16 = vld [vmem:[%s1262_s4 + $0x40] sm:$0xff]  ;;  %s1035_s17 = smul.u32 40, %s1272_s27  ;;  %v539_v20 = vld [vmem:[%s1262_s4 + $0x30] sm:$0xff]  ;;  %v538_v21 = vld [vmem:[%s1262_s4 + $0x28] sm:$0xff]  ;;  %vm724_vm4 = vcmask 293888   ;;  %vm530_vm5 = vcmask 517120  }
  0x10   : > { %571 = vmatprep.subr.mxu1 %v546_v3  ;;  %v451_v8 = vld [vmem:[%s405_s9 + $0x10] sm:$0x3]  ;;  %v450_v9 = vld [vmem:[%s405_s9 + $0x8] sm:$0xff]  ;;  %s399_s12 = scalar_lea.vmem %s1258_s0, %s1033_s22  ;;  %v449_v10 = vld [vmem:[%s405_s9] sm:$0xff]  ;;  %vm549_vm6 = vcmask 523264   ;;  %s988_s23 = sshll.u32 %s1272_s27, 1 }
  0x11   : > { %572 = vmatpush1.msra.mxu1 %v545_v4  ;;  %1012 = vmatpush3.msk.msra.mxu0 %vm456_vm1, %v451_v8  ;;  %v443_v12 = vld [vmem:[%s399_s12 + $0x28] sm:$0x3]  ;;  %v442_v13 = vld [vmem:[%s399_s12 + $0x20] sm:$0x3]  ;;  %v441_v14 = vld [vmem:[%s399_s12 + $0x18] sm:$0xff]  ;;  %s419_s24 = scalar_lea.vmem %s1263_s5, %s1035_s17  ;;  %s436_s26 = scalar_lea.vmem %s1266_s8, %s988_s23 }
  0x12   : > { %573 = vmatprep.subr.mxu1 %v544_v5  ;;  %1013 = vmatprep.subr.mxu0 %v1086_v0  ;;  %v440_v15 = vld [vmem:[%s399_s12 + $0x10] sm:$0xff]  ;;  %v439_v17 = vld [vmem:[%s399_s12 + $0x8] sm:$0xff]  ;;  %v438_v19 = vld [vmem:[%s399_s12] sm:$0xff]  ;;  %s1000_s9 = sshll.u32 %s1272_s27, 2 }
  0x13   : > { %574 = vmatpush1.msra.mxu1 %v543_v6  ;;  %1014 = vmatpush3.msra.mxu0 %v450_v9  ;;  %v437_v22 = vld [vmem:[%s1259_s1] sm:$0x3]  ;;  %v536_v25 = vld [vmem:[%s1262_s4 + $0x18] sm:$0xff]  ;;  %v535_v27 = vld [vmem:[%s1262_s4 + $0x10] sm:$0xff]  ;;  %s428_s12 = scalar_lea.vmem %s1265_s7, %s1000_s9 }
  0x14   : > { %575 = vmatprep.subr.mxu1 %v542_v7  ;;  %1015 = vmatprep.subr.mxu0 %v1086_v0  ;;  %v723_v23 = vld [vmem:[%s419_s24 + $0x20] sm:$0xf]  ;;  %v722_v26 = vld [vmem:[%s419_s24 + $0x18] sm:$0xff]  ;;  %v534_v28 = vld [vmem:[%s1262_s4 + $0x8] sm:$0xff] }
  0x15   : > { %1016 = vmatpush3.msra.mxu0 %v449_v10  ;;  %576 = vmatpush1.msra.mxu1 %v541_v16  ;;  %v537_v24 = vld [vmem:[%s1262_s4 + $0x20] sm:$0xff]  ;;  %v721_v29 = vld [vmem:[%s419_s24 + $0x10] sm:$0xff]  ;;  %v720_v31 = vld [vmem:[%s419_s24 + $0x8] sm:$0xff] }
  0x16   : > { %1018 = vmatmul.mubr.msk.f32.vlgmr.msra.gmra.mxu0 %vm452_vm2, %v448_v11  ;;  %992 = vmatprep.subr.msk.mxu0 %vm456_vm1, %v443_v12  ;;  %v533_v30 = vld [vmem:[%s1262_s4] sm:$0xff] }
  0x17   : > { %993 = vmatpush1.msk.msra.mxu0 %vm456_vm1, %v442_v13  ;;  %699 = vmatprep.mubr.f32.mxu0 %v1086_v0  ;;  %v719_v32 = vld [vmem:[%s419_s24] sm:$0xff] }
  0x18   : > { %663 = vmatprep.subr.mxu0 %v441_v14  ;;  %577 = vmatprep.subr.mxu1 %v540_v18  ;;  %v718_v33 = vld [vmem:[%s1264_s6] sm:$0x3] }
  0x19   : > { %664 = vmatpush1.msra.mxu0 %v440_v15  ;;  %578 = vmatpush1.msra.mxu1 %v539_v20 }
  0x1a   : > { %665 = vmatprep.subr.mxu0 %v439_v17  ;;  %579 = vmatprep.subr.mxu1 %v538_v21 }
  0x1b   : > { %666 = vmatpush1.msra.mxu0 %v438_v19  ;;  %580 = vmatpush1.msra.mxu1 %v537_v24 }
  0x1c   : > { %1020 = vmatprep.subr.mxu0 %v1086_v0  ;;  %994 = vmatmul.mubr.msk.f32.vlgmr.msra.gmra.mxu0 %vm452_vm2, %v437_v22 }
  0x1d   : > { %1021 = vmatpush3.msk.msra.mxu0 %vm728_vm3, %v723_v23  ;;  %581 = vmatprep.subr.mxu1 %v536_v25 }
  0x1e   : > { %1022 = vmatprep.subr.mxu0 %v1086_v0  ;;  %582 = vmatpush1.msra.mxu1 %v535_v27 }
  0x1f   : > { %1023 = vmatpush3.msra.mxu0 %v722_v26  ;;  %583 = vmatprep.subr.mxu1 %v534_v28 }
  0x20   : > { %1024 = vmatprep.subr.mxu0 %v1086_v0  ;;  %584 = vmatpush1.msra.mxu1 %v533_v30 }
  0x21   : > { %1025 = vmatpush3.msra.mxu0 %v721_v29  ;;  %1030 = vmatprep.mubr.msk.f32.mxu0 %vm1087_vm0, %v1086_v0 }
  0x22   : > { %1026 = vmatprep.subr.mxu0 %v1086_v0 }
  0x23   : > { %1027 = vmatpush3.msra.mxu0 %v720_v31 }
  0x24   : > { %1028 = vmatprep.subr.mxu0 %v1086_v0 }
  0x25   : > { %1029 = vmatpush3.msra.mxu0 %v719_v32 }
  0x26   : > { %1031 = vmatmul.mubr.msk.f32.vlgmr.msra.gmra.mxu0 %vm724_vm4, %v718_v33 }
  0xd6   : > { %v526_v34 = vpop.f32.mrf.mxu0 }
  0xd7   : > { %531 = vst.msk [vmem:[#allocation2] sm:$0x3] %vm530_vm5, %v526_v34 }
  0xd8   : > { %v1019_v35 = vpop.f32.mrf.mxu0 }
  0xdc   : > { %v701_v37 = vpop.f32.mrf.mxu0 }
  0xde   : > { %v532_v36 = vld [vmem:[#allocation2] sm:$0x3]  ;;  %v703_v38 = vpop.f32.mrf.mxu0 }
  0xdf   : > { %991 = vmatmul.mubr.msk.f32.vlgmr.msra.gmra.mxu1 %vm549_vm6, %v532_v36 }
  0xe6   : > { %v798_v39 = vpop.f32.mrf.mxu0 }
  0xe7   : > { %803 = vst.msk [vmem:[%s436_s26] sm:$0x3] %vm530_vm5, %v798_v39 }
  0xe8   : > { %v1032_v40 = vpop.f32.mrf.mxu0 }
 0x19f   : > { %v619_v41 = vpop.f32.mrf.mxu1 }
 0x1a0   : > { %v702_v43 = vadd.f32 %v701_v37, %v619_v41 }
 0x1a1   : > { %v621_v42 = vpop.f32.mrf.mxu1 }
 0x1a2   : > { %v704_v44 = vadd.f32 %v703_v38, %v621_v42 }
 0x1a4   : > { %v708_v45 = vcombine.low %v702_v43, %v704_v44 }
 0x1a6   : > { %995 = vst.sshfl [vmem:[%s428_s12] sm:$0x33 pattern:$0x76325410] %v708_v45 }
 0x1a7 PF: > { %s19_s29 = sadd.s32 1, %s1084_s29   ;;  %s1267_s27 = smov %s1080_s28 }
 0x1a8   : > { %p16_p5 = scmp.ge.s32.totalorder %s19_s29, 4   ;;  %s1268_s28 = smov %s1270_s30 }
 0x1aa   :  { %18 = sbr.rel (!%p16_p5) target bundleno = 2 (0x2), region = 103 }

</bundles_post_ra>
